<compile_context>
chip_gen: v5e
topology: v5e:2x2
jax: 0.10.0
libtpu: 0.0.40
codegen_flags: <defaults>
</compile_context>

<pallas_src>
import functools

import jax
import jax.numpy as jnp
from jax.experimental import pallas as pl
from jax.experimental.pallas import tpu as pltpu


# ---------------------------------------------------------------------------
# Fused kernel: both branch MLPs + LeakyReLU + sigmoid gating + projection.
# Weights are packed (branch-fused, region-block-diagonal) by pack_params().
# ---------------------------------------------------------------------------
def _diffspot_fused_kernel(img_ref, diff_ref,
                           w1_ref, b1_ref, w2_ref, b2_ref,
                           wp_ref, bp_ref,
                           out_ref, *, rh, compute_dtype):
    # Layer 1: one K=N=2*R*V / 2*R*H matmul covering BOTH branches.
    x = jnp.concatenate([img_ref[...], diff_ref[...]], axis=-1)       # (TB, 2*R*V)
    h = jnp.dot(x.astype(compute_dtype), w1_ref[...],
                preferred_element_type=jnp.float32) + b1_ref[...]
    h = jnp.maximum(h, 0.2 * h)                                       # LeakyReLU(0.2)

    # Layer 2 (both branches, still block-diagonal packed).
    y = jnp.dot(h.astype(compute_dtype), w2_ref[...],
                preferred_element_type=jnp.float32) + b2_ref[...]     # (TB, 2*R*H)

    y_img = y[:, :rh]                        # img branch, region-major flatten
    y_diff = y[:, rh:]                       # diff branch
    feat = jax.nn.sigmoid(y_img * y_diff)    # gating (EUP exp/recip)

    # Projection: flatten(cat(img, feat)) @ Wproj == [y_img | feat] @ Wp_pad.
    z = jnp.concatenate([y_img, feat], axis=-1)                       # (TB, 2*R*H)
    out_ref[...] = (jnp.dot(z.astype(compute_dtype), wp_ref[...],
                            preferred_element_type=jnp.float32) + bp_ref[...])


# ---------------------------------------------------------------------------
# One-time weight packing (hoisted out of the per-call forward path).
# ---------------------------------------------------------------------------
def pack_params(params, R, *, compute_dtype=jnp.bfloat16, lane=128):
    f32 = jnp.float32
    H = params["w1a"].shape[1]
    O = params["wproj"].shape[1]
    RH = R * H
    eye_r = jnp.eye(R, dtype=f32)

    def blockdiag(a, b):
        za = jnp.zeros((a.shape[0], b.shape[1]), f32)
        zb = jnp.zeros((b.shape[0], a.shape[1]), f32)
        return jnp.block([[a, za], [zb, b]])

    # Branch-fused, region-block-diagonal layer weights.
    w1 = blockdiag(jnp.kron(eye_r, params["w1a"]), jnp.kron(eye_r, params["w1b"]))
    w2 = blockdiag(jnp.kron(eye_r, params["w2a"]), jnp.kron(eye_r, params["w2b"]))
    b1 = jnp.concatenate([jnp.tile(params["b1a"], (1, R)),
                          jnp.tile(params["b1b"], (1, R))], axis=1)
    b2 = jnp.concatenate([jnp.tile(params["b2a"], (1, R)),
                          jnp.tile(params["b2b"], (1, R))], axis=1)

    # Lane-dense projection: zero-pad the output dim up to a multiple of 128.
    o_pad = max(lane, ((O + lane - 1) // lane) * lane)
    wp = jnp.zeros((2 * RH, o_pad), f32).at[:, :O].set(params["wproj"])
    bp = jnp.zeros((1, o_pad), f32).at[:, :O].set(params["bproj"])

    return dict(w1=w1.astype(compute_dtype), b1=b1,
                w2=w2.astype(compute_dtype), b2=b2,
                wp=wp.astype(compute_dtype), bp=bp)


def _choose_batch_tile(B):
    # Balanced, sublane-aligned tiles.  Prefer >=2 steps (v7x megacore
    # sharding + DMA/compute overlap) when B permits; otherwise one full block.
    if B < 16:
        return B
    cap = 512                                   # amortizes ~0.35us/step on v5e/v6e
    num_tiles = max(2, pl.cdiv(B, cap))
    tb = ((pl.cdiv(B, num_tiles) + 7) // 8) * 8
    return min(tb, B)


def diffspot_forward(img, diff_img, packed, *, output_dim, batch_tile=None):
    """img, diff_img: (B, R, V).  packed: pack_params() output.
    Returns (B, output_dim) float32 logits."""
    B, R, V = img.shape
    RV = R * V
    two_rh = packed["w2"].shape[1]
    RH = two_rh // 2
    o_pad = packed["wp"].shape[1]
    f32 = jnp.float32
    compute_dtype = packed["w1"].dtype

    img2 = img.reshape(B, RV).astype(f32)       # region-major, lane-dense flatten
    diff2 = diff_img.reshape(B, RV).astype(f32)

    TB = batch_tile if batch_tile is not None else _choose_batch_tile(B)
    grid = (pl.cdiv(B, TB),)

    act_spec = pl.BlockSpec((TB, RV), lambda i: (i, 0))

    def pinned(shape):
        # Same block every grid step -> weight stays resident in VMEM.
        return pl.BlockSpec(shape, lambda i: (0, 0))

    wbytes = jnp.dtype(compute_dtype).itemsize
    cost = pl.CostEstimate(
        flops=2 * B * (2 * two_rh * two_rh + two_rh * o_pad),
        transcendentals=B * RH,
        bytes_accessed=(wbytes * (2 * two_rh * two_rh + two_rh * o_pad)
                        + 4 * (2 * two_rh + o_pad)
                        + 4 * (2 * B * RV + B * o_pad)),
    )

    kernel = functools.partial(_diffspot_fused_kernel, rh=RH,
                               compute_dtype=compute_dtype)

    logit_pad = pl.pallas_call(
        kernel,
        out_shape=jax.ShapeDtypeStruct((B, o_pad), f32),
        grid=grid,
        in_specs=[
            act_spec, act_spec,
            pinned((two_rh, two_rh)), pinned((1, two_rh)),
            pinned((two_rh, two_rh)), pinned((1, two_rh)),
            pinned((two_rh, o_pad)), pinned((1, o_pad)),
        ],
        out_specs=pl.BlockSpec((TB, o_pad), lambda i: (i, 0)),
        compiler_params=pltpu.CompilerParams(
            dimension_semantics=("parallel",),   # shards batch tiles across TCs
            vmem_limit_bytes=32 * 1024 * 1024,
        ),
        cost_estimate=cost,
    )(img2, diff2,
      packed["w1"], packed["b1"], packed["w2"], packed["b2"],
      packed["wp"], packed["bp"])

    return logit_pad[:, :output_dim]             # drop the lane padding


# ---------------------------------------------------------------------------
# Deterministic parameter init (PyTorch nn.Linear-style uniform init).
# Weights stored as (in_features, out_features) so kernels compute x @ W + b.
# ---------------------------------------------------------------------------
def init_params(key, V, H, R, O):
    def linear(key, fan_in, fan_out):
        kw, kb = jax.random.split(key)
        bound = 1.0 / jnp.sqrt(fan_in)
        w = jax.random.uniform(kw, (fan_in, fan_out), jnp.float32, -bound, bound)
        b = jax.random.uniform(kb, (1, fan_out), jnp.float32, -bound, bound)
        return w, b

    keys = jax.random.split(key, 5)
    w1a, b1a = linear(keys[0], V, H)
    w2a, b2a = linear(keys[1], H, H)
    w1b, b1b = linear(keys[2], V, H)
    w2b, b2b = linear(keys[3], H, H)
    wproj, bproj = linear(keys[4], 2 * R * H, O)
    return dict(w1a=w1a, b1a=b1a, w2a=w2a, b2a=b2a,
                w1b=w1b, b1b=b1b, w2b=w2b, b2b=b2b,
                wproj=wproj, bproj=bproj)


def reference_forward(img, diff_img, p):
    """Pure-JAX f32 reference mirroring the PyTorch forward exactly."""
    def leaky(x):
        return jnp.where(x >= 0, x, 0.2 * x)

    x = leaky(img @ p["w1a"] + p["b1a"]) @ p["w2a"] + p["b2a"]       # (B,R,H)
    d = leaky(diff_img @ p["w1b"] + p["b1b"]) @ p["w2b"] + p["b2b"]  # (B,R,H)
    feat = jax.nn.sigmoid(x * d)
    cat = jnp.concatenate([x, feat], axis=1)                         # (B,2R,H)
    flat = cat.reshape(img.shape[0], -1)                             # (B,2RH)
    return flat @ p["wproj"] + p["bproj"]


if __name__ == "__main__":
    # Small shapes consistent with the module:
    #   batch B=2, regions_in_image R=4, visual_feature_dimension V=32,
    #   hidden_dimension H=32, output_dimension O=16.
    B, R, V, H, O = 2, 4, 32, 32, 16

    key = jax.random.PRNGKey(0)
    k_img, k_diff, k_par = jax.random.split(key, 3)
    img = jax.random.normal(k_img, (B, R, V), jnp.float32)
    diff_img = jax.random.normal(k_diff, (B, R, V), jnp.float32)
    params = init_params(k_par, V, H, R, O)

    # One-time packing (hoisted out of the hot forward path).
    packed = pack_params(params, R)

    fwd = jax.jit(functools.partial(diffspot_forward, output_dim=O))
    logit = jax.block_until_ready(fwd(img, diff_img, packed))

    ref = reference_forward(img, diff_img, params)
    assert logit.shape == (B, O)
    # bf16 matmul operands (f32 accumulate) -> loosened tolerance vs f32 ref.
    assert jnp.allclose(logit, ref, atol=5e-2, rtol=5e-2), "mismatch vs reference"

    print("KERNEL_OK")
</pallas_src>

<mosaic_0001>
module attributes {stable_mosaic.version = 11 : i64} {
  func.func @_diffspot_fused_kernel(%arg0: i32, %arg1: memref<2x128xf32, #tpu.memory_space<vmem>>, %arg2: memref<2x128xf32, #tpu.memory_space<vmem>>, %arg3: memref<256x256xbf16, #tpu.memory_space<vmem>>, %arg4: memref<1x256xf32, #tpu.memory_space<vmem>>, %arg5: memref<256x256xbf16, #tpu.memory_space<vmem>>, %arg6: memref<1x256xf32, #tpu.memory_space<vmem>>, %arg7: memref<256x128xbf16, #tpu.memory_space<vmem>>, %arg8: memref<1x128xf32, #tpu.memory_space<vmem>>, %arg9: memref<2x128xf32, #tpu.memory_space<vmem>>) attributes {dimension_semantics = [#tpu.dimension_semantics<parallel>], iteration_bounds = array<i64: 1>, scalar_prefetch = 0 : i64, scratch_operands = 0 : i64, tpu.core_type = #tpu.core_type<tc>, window_params = [{transform_indices = @transform_0, window_bounds = array<i64: 2, 128>}, {transform_indices = @transform_1, window_bounds = array<i64: 2, 128>}, {pipeline_mode = #tpu.pipeline_mode<synchronous>, transform_indices = @transform_2, window_bounds = array<i64: 256, 256>}, {pipeline_mode = #tpu.pipeline_mode<synchronous>, transform_indices = @transform_3, window_bounds = array<i64: 1, 256>}, {pipeline_mode = #tpu.pipeline_mode<synchronous>, transform_indices = @transform_4, window_bounds = array<i64: 256, 256>}, {pipeline_mode = #tpu.pipeline_mode<synchronous>, transform_indices = @transform_5, window_bounds = array<i64: 1, 256>}, {pipeline_mode = #tpu.pipeline_mode<synchronous>, transform_indices = @transform_6, window_bounds = array<i64: 256, 128>}, {pipeline_mode = #tpu.pipeline_mode<synchronous>, transform_indices = @transform_7, window_bounds = array<i64: 1, 128>}, {transform_indices = @transform_8, window_bounds = array<i64: 2, 128>}]} {
    %c0 = arith.constant 0 : index
    %c0_0 = arith.constant 0 : index
    %0 = vector.load %arg1[%c0, %c0_0] : memref<2x128xf32, #tpu.memory_space<vmem>>, vector<2x128xf32>
    %c0_1 = arith.constant 0 : index
    %c0_2 = arith.constant 0 : index
    %1 = vector.load %arg2[%c0_1, %c0_2] : memref<2x128xf32, #tpu.memory_space<vmem>>, vector<2x128xf32>
    %2 = tpu.concatenate %0, %1 in 1 : vector<2x128xf32>, vector<2x128xf32> -> vector<2x256xf32>
    %3 = arith.truncf %2 : vector<2x256xf32> to vector<2x256xbf16>
    %c0_3 = arith.constant 0 : index
    %c0_4 = arith.constant 0 : index
    %4 = vector.load %arg3[%c0_3, %c0_4] : memref<256x256xbf16, #tpu.memory_space<vmem>>, vector<256x256xbf16>
    %cst = arith.constant dense<0.000000e+00> : vector<2x256xf32>
    %5 = tpu.matmul %3, %4, %cst {dimension_numbers = #tpu.dot_dimension_numbers<[1], [0], [0], [1], [0, 0, 1, 1], [], []>} : vector<2x256xbf16>, vector<256x256xbf16>, vector<2x256xf32> -> vector<2x256xf32>
    %c0_5 = arith.constant 0 : index
    %c0_6 = arith.constant 0 : index
    %6 = vector.load %arg4[%c0_5, %c0_6] : memref<1x256xf32, #tpu.memory_space<vmem>>, vector<1x256xf32>
    %7 = vector.broadcast %6 : vector<1x256xf32> to vector<2x256xf32>
    %8 = arith.addf %5, %7 : vector<2x256xf32>
    %cst_7 = arith.constant 2.000000e-01 : f32
    %9 = vector.broadcast %cst_7 : f32 to vector<2x256xf32>
    %10 = arith.mulf %9, %8 : vector<2x256xf32>
    %11 = arith.maximumf %8, %10 : vector<2x256xf32>
    %12 = arith.truncf %11 : vector<2x256xf32> to vector<2x256xbf16>
    %c0_8 = arith.constant 0 : index
    %c0_9 = arith.constant 0 : index
    %13 = vector.load %arg5[%c0_8, %c0_9] : memref<256x256xbf16, #tpu.memory_space<vmem>>, vector<256x256xbf16>
    %cst_10 = arith.constant dense<0.000000e+00> : vector<2x256xf32>
    %14 = tpu.matmul %12, %13, %cst_10 {dimension_numbers = #tpu.dot_dimension_numbers<[1], [0], [0], [1], [0, 0, 1, 1], [], []>} : vector<2x256xbf16>, vector<256x256xbf16>, vector<2x256xf32> -> vector<2x256xf32>
    %c0_11 = arith.constant 0 : index
    %c0_12 = arith.constant 0 : index
    %15 = vector.load %arg6[%c0_11, %c0_12] : memref<1x256xf32, #tpu.memory_space<vmem>>, vector<1x256xf32>
    %16 = vector.broadcast %15 : vector<1x256xf32> to vector<2x256xf32>
    %17 = arith.addf %14, %16 : vector<2x256xf32>
    %18 = vector.extract_strided_slice %17 {offsets = [0, 0], sizes = [2, 128], strides = [1, 1]} : vector<2x256xf32> to vector<2x128xf32>
    %19 = vector.extract_strided_slice %17 {offsets = [0, 128], sizes = [2, 128], strides = [1, 1]} : vector<2x256xf32> to vector<2x128xf32>
    %20 = arith.mulf %18, %19 : vector<2x128xf32>
    %21 = arith.negf %20 : vector<2x128xf32>
    %22 = math.exp %21 : vector<2x128xf32>
    %cst_13 = arith.constant 1.000000e+00 : f32
    %23 = vector.broadcast %cst_13 : f32 to vector<2x128xf32>
    %24 = arith.addf %23, %22 : vector<2x128xf32>
    %25 = arith.divf %23, %24 : vector<2x128xf32>
    %26 = tpu.concatenate %18, %25 in 1 : vector<2x128xf32>, vector<2x128xf32> -> vector<2x256xf32>
    %27 = arith.truncf %26 : vector<2x256xf32> to vector<2x256xbf16>
    %c0_14 = arith.constant 0 : index
    %c0_15 = arith.constant 0 : index
    %28 = vector.load %arg7[%c0_14, %c0_15] : memref<256x128xbf16, #tpu.memory_space<vmem>>, vector<256x128xbf16>
    %cst_16 = arith.constant dense<0.000000e+00> : vector<2x128xf32>
    %29 = tpu.matmul %27, %28, %cst_16 {dimension_numbers = #tpu.dot_dimension_numbers<[1], [0], [0], [1], [0, 0, 1, 1], [], []>} : vector<2x256xbf16>, vector<256x128xbf16>, vector<2x128xf32> -> vector<2x128xf32>
    %c0_17 = arith.constant 0 : index
    %c0_18 = arith.constant 0 : index
    %30 = vector.load %arg8[%c0_17, %c0_18] : memref<1x128xf32, #tpu.memory_space<vmem>>, vector<1x128xf32>
    %31 = vector.broadcast %30 : vector<1x128xf32> to vector<2x128xf32>
    %32 = arith.addf %29, %31 : vector<2x128xf32>
    %c0_19 = arith.constant 0 : index
    %c0_20 = arith.constant 0 : index
    %33 = vector.load %arg9[%c0_19, %c0_20] : memref<2x128xf32, #tpu.memory_space<vmem>>, vector<2x128xf32>
    tpu.vector_store %arg9[%c0_19, %c0_20], %32 {strides = array<i32>} : memref<2x128xf32, #tpu.memory_space<vmem>>, vector<2x128xf32>,
    return
  }
  func.func @transform_0(%arg0: i32) -> (i32, i32) {
    %c0_i32 = arith.constant 0 : i32
    %c0_i32_0 = arith.constant 0 : i32
    return %arg0, %c0_i32 : i32, i32
  }
  func.func @transform_1(%arg0: i32) -> (i32, i32) {
    %c0_i32 = arith.constant 0 : i32
    %c0_i32_0 = arith.constant 0 : i32
    return %arg0, %c0_i32 : i32, i32
  }
  func.func @transform_2(%arg0: i32) -> (i32, i32) {
    %c0_i32 = arith.constant 0 : i32
    %c0_i32_0 = arith.constant 0 : i32
    %c0_i32_1 = arith.constant 0 : i32
    return %c0_i32, %c0_i32_0 : i32, i32
  }
  func.func @transform_3(%arg0: i32) -> (i32, i32) {
    %c0_i32 = arith.constant 0 : i32
    %c0_i32_0 = arith.constant 0 : i32
    %c0_i32_1 = arith.constant 0 : i32
    return %c0_i32, %c0_i32_0 : i32, i32
  }
  func.func @transform_4(%arg0: i32) -> (i32, i32) {
    %c0_i32 = arith.constant 0 : i32
    %c0_i32_0 = arith.constant 0 : i32
    %c0_i32_1 = arith.constant 0 : i32
    return %c0_i32, %c0_i32_0 : i32, i32
  }
  func.func @transform_5(%arg0: i32) -> (i32, i32) {
    %c0_i32 = arith.constant 0 : i32
    %c0_i32_0 = arith.constant 0 : i32
    %c0_i32_1 = arith.constant 0 : i32
    return %c0_i32, %c0_i32_0 : i32, i32
  }
  func.func @transform_6(%arg0: i32) -> (i32, i32) {
    %c0_i32 = arith.constant 0 : i32
    %c0_i32_0 = arith.constant 0 : i32
    %c0_i32_1 = arith.constant 0 : i32
    return %c0_i32, %c0_i32_0 : i32, i32
  }
  func.func @transform_7(%arg0: i32) -> (i32, i32) {
    %c0_i32 = arith.constant 0 : i32
    %c0_i32_0 = arith.constant 0 : i32
    %c0_i32_1 = arith.constant 0 : i32
    return %c0_i32, %c0_i32_0 : i32, i32
  }
  func.func @transform_8(%arg0: i32) -> (i32, i32) {
    %c0_i32 = arith.constant 0 : i32
    %c0_i32_0 = arith.constant 0 : i32
    return %arg0, %c0_i32 : i32, i32
  }
}

</mosaic_0001>

<bundles_post_ra>
// kernel: diffspot_forward.1
= control target key start
LH: loop header
LB: loop body
LE: loop exit
PB: predicated region body
PF: predicated region fallthrough
CT: control target
= control target key end

     0   :  { %13 = vsyncpa [#allocation3], 0  ;;  %s1382_s0 = inlined_call_operand.vmem [shape: f32[2,128], index: 0, kind: input, shape index: {}]   ;;  %s1383_s1 = inlined_call_operand.vmem [shape: f32[2,128], index: 1, kind: input, shape index: {}]   ;;  %s1384_s2 = inlined_call_operand.hbm [shape: bf16[256,256], index: 2, kind: input, shape index: {}]   ;;  %s1385_s3 = inlined_call_operand.vmem [shape: f32[1,256], index: 3, kind: input, shape index: {}]   ;;  %s1386_s4 = inlined_call_operand.hbm [shape: bf16[256,256], index: 4, kind: input, shape index: {}]   ;;  %s1387_s5 = inlined_call_operand.vmem [shape: f32[1,256], index: 5, kind: input, shape index: {}]   ;;  %s1388_s6 = inlined_call_operand.hbm [shape: bf16[256,128], index: 6, kind: input, shape index: {}]   ;;  %s1389_s7 = inlined_call_operand.vmem [shape: f32[1,128], index: 7, kind: input, shape index: {}]   ;;  %s1390_s8 = inlined_call_operand.hbm [shape: f32[2,128], index: 8, kind: output, shape index: {}]  }
   0x1   :  { %14 = vsyncpa [#allocation6], 0 }
   0x2   :  { %15 = vsyncpa [#allocation4], 0  ;;  %s39_s29 = sshll.u32 %s1386_s4, 4  ;;  %s1302_s30 = smov [#allocation5]   ;;  %s40_s29 = int_to_ptr.hbm [resolvable:$true] %s39_s29 }
   0x3   :  { %s41_s9 = sshll.u32 %s1302_s30, 4  ;;  %s24_s12 = sshll.u32 %s1384_s2, 4  ;;  %s42_s9 = int_to_ptr.vmem [resolvable:$true] %s41_s9  ;;  %s25_s12 = int_to_ptr.hbm [resolvable:$true] %s24_s12 }
   0x4   :  { %s1303_s13 = smov 128   ;;  %s1304_s14 = smov 8  }
   0x5   :  { %47 = dma.hbm_to_vmem [thread:$0]  %s40_s29, 4096, %s42_s9, [#allocation6], %s1303_s13, %s1303_s13, %s1304_s14  }
   0x6   :  { %s1305_s15 = smov [#allocation2]   ;;  %s54_s19 = sshll.u32 %s1388_s6, 4  ;;  %s55_s19 = int_to_ptr.hbm [resolvable:$true] %s54_s19 }
   0x7   :  { %s26_s16 = sshll.u32 %s1305_s15, 4  ;;  %s1306_s4 = smov [#allocation7]   ;;  %s27_s16 = int_to_ptr.vmem [resolvable:$true] %s26_s16 }
   0x8   :  { %32 = dma.hbm_to_vmem [thread:$0]  %s25_s12, 4096, %s27_s16, [#allocation3], %s1303_s13, %s1303_s13, %s1304_s14  }
   0x9   :  { %s56_s20 = sshll.u32 %s1306_s4, 4  ;;  %s1307_s21 = smov 64   ;;  %s57_s20 = int_to_ptr.vmem [resolvable:$true] %s56_s20 }
   0xa   :  { %s1308_s22 = smov 4  }
   0xb   :  { %62 = dma.hbm_to_vmem [thread:$0]  %s55_s19, 2048, %s57_s20, [#allocation6], %s1307_s21, %s1307_s21, %s1308_s22  }
   0xc   :  { %1296 = dma.done.wait [#allocation3], 4096  }
   0xd   :  { %1297 = vsyncadd [#allocation3], 4294963200 }
   0xe   :  { %1298 = dma.done.wait [#allocation6], 6144  }
   0xf   :  { %1299 = vsyncadd [#allocation6], 4294961152  ;;  %v844_v0 = vld [vmem:[#allocation2 + $0x70] sm:$0xf]  ;;  %v1122_v1 = vld [vmem:[#allocation2 + $0x74] sm:$0xf0] }
  0x10   :  { %v908_v2 = vld [vmem:[#allocation2 + $0xf0] sm:$0xf]  ;;  %v845_v3 = vor.u32 %v1122_v1, %v844_v0  ;;  %v1138_v4 = vld [vmem:[#allocation2 + $0xf4] sm:$0xf0]  ;;  %v1121_v5 = vld [vmem:[#allocation2 + $0x74] sm:$0xf] }
  0x11   :  { %v846_v6 = vld [vmem:[#allocation2 + $0x78] sm:$0xf0]  ;;  %v909_v7 = vor.u32 %v1138_v4, %v908_v2  ;;  %v1137_v9 = vld [vmem:[#allocation2 + $0xf4] sm:$0xf]  ;;  %v836_v11 = vld [vmem:[#allocation2 + $0x60] sm:$0xf] }
  0x12   :  { %v849_v8 = vor.u32 %v1121_v5, %v846_v6  ;;  %v910_v10 = vld [vmem:[#allocation2 + $0xf8] sm:$0xf0]  ;;  %279 = vmatpush.bf16.msra.mxu0 %v845_v3  ;;  %v1120_v13 = vld [vmem:[#allocation2 + $0x64] sm:$0xf0]  ;;  %v900_v14 = vld [vmem:[#allocation2 + $0xe0] sm:$0xf] }
  0x13   :  { %v913_v12 = vor.u32 %v1137_v9, %v910_v10  ;;  %v1136_v15 = vld [vmem:[#allocation2 + $0xe4] sm:$0xf0]  ;;  %292 = vmatpush.bf16.msra.mxu1 %v909_v7  ;;  %v837_v16 = vor.u32 %v1120_v13, %v836_v11  ;;  %v1119_v18 = vld [vmem:[#allocation2 + $0x64] sm:$0xf]  ;;  %v838_v19 = vld [vmem:[#allocation2 + $0x68] sm:$0xf0] }
  0x14   :  { %305 = vmatpush.bf16.msra.mxu2 %v849_v8  ;;  %v901_v17 = vor.u32 %v1136_v15, %v900_v14  ;;  %v1135_v20 = vld [vmem:[#allocation2 + $0xe4] sm:$0xf]  ;;  %v841_v21 = vor.u32 %v1119_v18, %v838_v19  ;;  %v902_v22 = vld [vmem:[#allocation2 + $0xe8] sm:$0xf0]  ;;  %v828_v23 = vld [vmem:[#allocation2 + $0x50] sm:$0xf] }
  0x15   :  { %318 = vmatpush.bf16.msra.mxu3 %v913_v12  ;;  %v1118_v24 = vld [vmem:[#allocation2 + $0x54] sm:$0xf0]  ;;  %v905_v25 = vor.u32 %v1135_v20, %v902_v22  ;;  %v892_v26 = vld [vmem:[#allocation2 + $0xd0] sm:$0xf]  ;;  %v1117_v28 = vld [vmem:[#allocation2 + $0x54] sm:$0xf] }
  0x16   :  { %v1134_v27 = vld [vmem:[#allocation2 + $0xd4] sm:$0xf0]  ;;  %280 = vmatpush.bf16.msra.mxu0 %v837_v16  ;;  %v829_v29 = vor.u32 %v1118_v24, %v828_v23  ;;  %v830_v30 = vld [vmem:[#allocation2 + $0x58] sm:$0xf0]  ;;  %v1133_v31 = vld [vmem:[#allocation2 + $0xd4] sm:$0xf] }
  0x17   :  { %v894_v32 = vld [vmem:[#allocation2 + $0xd8] sm:$0xf0]  ;;  %293 = vmatpush.bf16.msra.mxu1 %v901_v17  ;;  %v893_v33 = vor.u32 %v1134_v27, %v892_v26  ;;  %v833_v34 = vor.u32 %v1117_v28, %v830_v30  ;;  %v820_v35 = vld [vmem:[#allocation2 + $0x40] sm:$0xf]  ;;  %v1116_v36 = vld [vmem:[#allocation2 + $0x44] sm:$0xf0] }
  0x18   :  { %306 = vmatpush.bf16.msra.mxu2 %v841_v21  ;;  %v884_v37 = vld [vmem:[#allocation2 + $0xc0] sm:$0xf]  ;;  %v897_v38 = vor.u32 %v1133_v31, %v894_v32  ;;  %v1132_v39 = vld [vmem:[#allocation2 + $0xc4] sm:$0xf0]  ;;  %v1115_v40 = vld [vmem:[#allocation2 + $0x44] sm:$0xf]  ;;  %v821_v44 = vor.u32 %v1116_v36, %v820_v35 }
  0x19   :  { %319 = vmatpush.bf16.msra.mxu3 %v905_v25  ;;  %v822_v41 = vld [vmem:[#allocation2 + $0x48] sm:$0xf0]  ;;  %v1131_v42 = vld [vmem:[#allocation2 + $0xc4] sm:$0xf]  ;;  %v885_v45 = vor.u32 %v1132_v39, %v884_v37  ;;  %v812_v47 = vld [vmem:[#allocation2 + $0x30] sm:$0xf] }
  0x1a   :  { %v886_v43 = vld [vmem:[#allocation2 + $0xc8] sm:$0xf0]  ;;  %281 = vmatpush.bf16.msra.mxu0 %v829_v29  ;;  %v825_v46 = vor.u32 %v1115_v40, %v822_v41  ;;  %v1114_v48 = vld [vmem:[#allocation2 + $0x34] sm:$0xf0]  ;;  %v876_v49 = vld [vmem:[#allocation2 + $0xb0] sm:$0xf] }
  0x1b   :  { %294 = vmatpush.bf16.msra.mxu1 %v893_v33  ;;  %v889_v50 = vor.u32 %v1131_v42, %v886_v43  ;;  %v1130_v51 = vld [vmem:[#allocation2 + $0xb4] sm:$0xf0]  ;;  %v1113_v52 = vld [vmem:[#allocation2 + $0x34] sm:$0xf]  ;;  %v814_v53 = vld [vmem:[#allocation2 + $0x38] sm:$0xf0]  ;;  %v813_v56 = vor.u32 %v1114_v48, %v812_v47 }
  0x1c   :  { %307 = vmatpush.bf16.msra.mxu2 %v833_v34  ;;  %v1129_v54 = vld [vmem:[#allocation2 + $0xb4] sm:$0xf]  ;;  %v878_v55 = vld [vmem:[#allocation2 + $0xb8] sm:$0xf0]  ;;  %v877_v57 = vor.u32 %v1130_v51, %v876_v49  ;;  %v817_v58 = vor.u32 %v1113_v52, %v814_v53  ;;  %v804_v59 = vld [vmem:[#allocation2 + $0x20] sm:$0xf] }
  0x1d   :  { %320 = vmatpush.bf16.msra.mxu3 %v897_v38  ;;  %v1112_v60 = vld [vmem:[#allocation2 + $0x24] sm:$0xf0]  ;;  %v868_v61 = vld [vmem:[#allocation2 + $0xa0] sm:$0xf]  ;;  %v881_v62 = vor.u32 %v1129_v54, %v878_v55  ;;  %v1111_v0 = vld [vmem:[#allocation2 + $0x24] sm:$0xf] }
  0x1e   :  { %282 = vmatpush.bf16.msra.mxu0 %v821_v44  ;;  %v1128_v63 = vld [vmem:[#allocation2 + $0xa4] sm:$0xf0]  ;;  %v806_v1 = vld [vmem:[#allocation2 + $0x28] sm:$0xf0]  ;;  %v1127_v2 = vld [vmem:[#allocation2 + $0xa4] sm:$0xf]  ;;  %v805_v4 = vor.u32 %v1112_v60, %v804_v59 }
  0x1f   :  { %295 = vmatpush.bf16.msra.mxu1 %v885_v45  ;;  %v870_v3 = vld [vmem:[#allocation2 + $0xa8] sm:$0xf0]  ;;  %v869_v5 = vor.u32 %v1128_v63, %v868_v61  ;;  %v809_v6 = vor.u32 %v1111_v0, %v806_v1  ;;  %v796_v7 = vld [vmem:[#allocation2 + $0x10] sm:$0xf]  ;;  %v1110_v8 = vld [vmem:[#allocation2 + $0x14] sm:$0xf0] }
  0x20   :  { %308 = vmatpush.bf16.msra.mxu2 %v825_v46  ;;  %v860_v9 = vld [vmem:[#allocation2 + $0x90] sm:$0xf]  ;;  %v873_v10 = vor.u32 %v1127_v2, %v870_v3  ;;  %v1126_v11 = vld [vmem:[#allocation2 + $0x94] sm:$0xf0]  ;;  %v1109_v12 = vld [vmem:[#allocation2 + $0x14] sm:$0xf]  ;;  %v797_v16 = vor.u32 %v1110_v8, %v796_v7 }
  0x21   :  { %321 = vmatpush.bf16.msra.mxu3 %v889_v50  ;;  %v798_v13 = vld [vmem:[#allocation2 + $0x18] sm:$0xf0]  ;;  %v1125_v14 = vld [vmem:[#allocation2 + $0x94] sm:$0xf]  ;;  %v788_v17 = vld [vmem:[#allocation2] sm:$0xf]  ;;  %v861_v18 = vor.u32 %v1126_v11, %v860_v9 }
  0x22   :  { %283 = vmatpush.bf16.msra.mxu0 %v813_v56  ;;  %v862_v15 = vld [vmem:[#allocation2 + $0x98] sm:$0xf0]  ;;  %v801_v19 = vor.u32 %v1109_v12, %v798_v13  ;;  %v1108_v20 = vld [vmem:[#allocation2 + $0x4] sm:$0xf0]  ;;  %v852_v21 = vld [vmem:[#allocation2 + $0x80] sm:$0xf] }
  0x23   :  { %296 = vmatpush.bf16.msra.mxu1 %v877_v57  ;;  %v1124_v22 = vld [vmem:[#allocation2 + $0x84] sm:$0xf0]  ;;  %v865_v23 = vor.u32 %v1125_v14, %v862_v15  ;;  %v1107_v24 = vld [vmem:[#allocation2 + $0x4] sm:$0xf]  ;;  %v790_v25 = vld [vmem:[#allocation2 + $0x8] sm:$0xf0]  ;;  %v789_v30 = vor.u32 %v1108_v20, %v788_v17 }
  0x24   :  { %309 = vmatpush.bf16.msra.mxu2 %v817_v58  ;;  %v1123_v26 = vld [vmem:[#allocation2 + $0x84] sm:$0xf]  ;;  %v854_v27 = vld [vmem:[#allocation2 + $0x88] sm:$0xf0]  ;;  %v972_v28 = vld [vmem:[#allocation5 + $0x70] sm:$0xf]  ;;  %v853_v34 = vor.u32 %v1124_v22, %v852_v21  ;;  %v793_v35 = vor.u32 %v1107_v24, %v790_v25 }
  0x25   :  { %322 = vmatpush.bf16.msra.mxu3 %v881_v62  ;;  %v1154_v29 = vld [vmem:[#allocation5 + $0x74] sm:$0xf0]  ;;  %v77_v31 = vld [vmem:[%s1382_s0] sm:$0x3]  ;;  %v1153_v32 = vld [vmem:[#allocation5 + $0x74] sm:$0xf]  ;;  %v857_v37 = vor.u32 %v1123_v26, %v854_v27 }
  0x26   :  { %284 = vmatpush.bf16.msra.mxu0 %v805_v4  ;;  %v974_v33 = vld [vmem:[#allocation5 + $0x78] sm:$0xf0]  ;;  %v78_v36 = vld [vmem:[%s1383_s1] sm:$0x3]  ;;  %v973_v38 = vor.u32 %v1154_v29, %v972_v28  ;;  %v1036_v40 = vld [vmem:[#allocation5 + $0xf0] sm:$0xf]  ;;  %v79_v42 = vpack.c.bf16 %v77_v31, %v77_v31 }
  0x27   :  { %297 = vmatpush.bf16.msra.mxu1 %v869_v5  ;;  %v964_v39 = vld [vmem:[#allocation5 + $0x60] sm:$0xf]  ;;  %v1170_v41 = vld [vmem:[#allocation5 + $0xf4] sm:$0xf0]  ;;  %v977_v43 = vor.u32 %v1153_v32, %v974_v33  ;;  %v1152_v44 = vld [vmem:[#allocation5 + $0x64] sm:$0xf0]  ;;  %v80_v47 = vpack.c.bf16 %v78_v36, %v78_v36 }
  0x28   :  { %310 = vmatpush.bf16.msra.mxu2 %v809_v6  ;;  %v1169_v45 = vld [vmem:[#allocation5 + $0xf4] sm:$0xf]  ;;  %v1038_v46 = vld [vmem:[#allocation5 + $0xf8] sm:$0xf0]  ;;  %v1151_v48 = vld [vmem:[#allocation5 + $0x64] sm:$0xf]  ;;  %v1037_v50 = vor.u32 %v1170_v41, %v1036_v40  ;;  %v965_v52 = vor.u32 %v1152_v44, %v964_v39 }
  0x29   :  { %323 = vmatpush.bf16.msra.mxu3 %v873_v10  ;;  %v966_v49 = vld [vmem:[#allocation5 + $0x68] sm:$0xf0]  ;;  %v956_v51 = vld [vmem:[#allocation5 + $0x50] sm:$0xf]  ;;  %v1041_v53 = vor.u32 %v1169_v45, %v1038_v46  ;;  %v1150_v54 = vld [vmem:[#allocation5 + $0x54] sm:$0xf0] }
  0x2a   :  { %285 = vmatpush.bf16.msra.mxu0 %v797_v16  ;;  %v1028_v55 = vld [vmem:[#allocation5 + $0xe0] sm:$0xf]  ;;  %v1168_v56 = vld [vmem:[#allocation5 + $0xe4] sm:$0xf0]  ;;  %v969_v57 = vor.u32 %v1151_v48, %v966_v49  ;;  %v1167_v58 = vld [vmem:[#allocation5 + $0xe4] sm:$0xf]  ;;  %v957_v63 = vor.u32 %v1150_v54, %v956_v51 }
  0x2b   :  { %298 = vmatpush.bf16.msra.mxu1 %v861_v18  ;;  %v1030_v59 = vld [vmem:[#allocation5 + $0xe8] sm:$0xf0]  ;;  %v1149_v60 = vld [vmem:[#allocation5 + $0x54] sm:$0xf]  ;;  %v958_v61 = vld [vmem:[#allocation5 + $0x58] sm:$0xf0]  ;;  %v1029_v62 = vor.u32 %v1168_v56, %v1028_v55 }
  0x2c   :  { %311 = vmatpush.bf16.msra.mxu2 %v801_v19  ;;  %v1033_v0 = vor.u32 %v1167_v58, %v1030_v59  ;;  %v948_v1 = vld [vmem:[#allocation5 + $0x40] sm:$0xf]  ;;  %v1020_v2 = vld [vmem:[#allocation5 + $0xd0] sm:$0xf]  ;;  %v1166_v3 = vld [vmem:[#allocation5 + $0xd4] sm:$0xf0]  ;;  %v961_v4 = vor.u32 %v1149_v60, %v958_v61 }
  0x2d   :  { %324 = vmatpush.bf16.msra.mxu3 %v865_v23  ;;  %v1148_v5 = vld [vmem:[#allocation5 + $0x44] sm:$0xf0]  ;;  %v1165_v6 = vld [vmem:[#allocation5 + $0xd4] sm:$0xf]  ;;  %v1022_v7 = vld [vmem:[#allocation5 + $0xd8] sm:$0xf0]  ;;  %v1021_v10 = vor.u32 %v1166_v3, %v1020_v2 }
  0x2e   :  { %286 = vmatpush.bf16.msra.mxu0 %v789_v30  ;;  %v1147_v8 = vld [vmem:[#allocation5 + $0x44] sm:$0xf]  ;;  %v950_v9 = vld [vmem:[#allocation5 + $0x48] sm:$0xf0]  ;;  %v949_v11 = vor.u32 %v1148_v5, %v948_v1  ;;  %v1025_v12 = vor.u32 %v1165_v6, %v1022_v7  ;;  %v940_v13 = vld [vmem:[#allocation5 + $0x30] sm:$0xf] }
  0x2f   :  { %299 = vmatpush.bf16.msra.mxu1 %v853_v34  ;;  %v1012_v14 = vld [vmem:[#allocation5 + $0xc0] sm:$0xf]  ;;  %v1164_v15 = vld [vmem:[#allocation5 + $0xc4] sm:$0xf0]  ;;  %v953_v16 = vor.u32 %v1147_v8, %v950_v9  ;;  %v1146_v17 = vld [vmem:[#allocation5 + $0x34] sm:$0xf0] }
  0x30   :  { %312 = vmatpush.bf16.msra.mxu2 %v793_v35  ;;  %v1163_v18 = vld [vmem:[#allocation5 + $0xc4] sm:$0xf]  ;;  %v1014_v19 = vld [vmem:[#allocation5 + $0xc8] sm:$0xf0]  ;;  %v1145_v20 = vld [vmem:[#allocation5 + $0x34] sm:$0xf]  ;;  %v1013_v22 = vor.u32 %v1164_v15, %v1012_v14  ;;  %v941_v23 = vor.u32 %v1146_v17, %v940_v13 }
  0x31   :  { %325 = vmatpush.bf16.msra.mxu3 %v857_v37  ;;  %287 = vmatmul.bf16.vlgmr.msra.gmra.mxu0 %v79_v42  ;;  %v942_v21 = vld [vmem:[#allocation5 + $0x38] sm:$0xf0]  ;;  %v1017_v24 = vor.u32 %v1163_v18, %v1014_v19  ;;  %v932_v26 = vld [vmem:[#allocation5 + $0x20] sm:$0xf]  ;;  %v1144_v27 = vld [vmem:[#allocation5 + $0x24] sm:$0xf0] }
  0x32   :  { %535 = vmatpush.bf16.msrb.mxu0 %v973_v38  ;;  %300 = vmatmul.bf16.vlgmr.msra.gmra.mxu1 %v80_v47  ;;  %v945_v25 = vor.u32 %v1145_v20, %v942_v21  ;;  %v1143_v28 = vld [vmem:[#allocation5 + $0x24] sm:$0xf]  ;;  %v933_v29 = vor.u32 %v1144_v27, %v932_v26  ;;  %v934_v30 = vld [vmem:[#allocation5 + $0x28] sm:$0xf0]  ;;  %v1004_v32 = vld [vmem:[#allocation5 + $0xb0] sm:$0xf] }
  0x33   :  { %313 = vmatmul.bf16.vlgmr.msra.gmra.mxu2 %v79_v42  ;;  %548 = vmatpush.bf16.msrb.mxu1 %v1037_v50  ;;  %v937_v31 = vor.u32 %v1143_v28, %v934_v30  ;;  %v1162_v33 = vld [vmem:[#allocation5 + $0xb4] sm:$0xf0]  ;;  %v1161_v34 = vld [vmem:[#allocation5 + $0xb4] sm:$0xf]  ;;  %v1006_v36 = vld [vmem:[#allocation5 + $0xb8] sm:$0xf0] }
  0x34   :  { %561 = vmatpush.bf16.msrb.mxu2 %v977_v43  ;;  %326 = vmatmul.bf16.vlgmr.msra.gmra.mxu3 %v80_v47  ;;  %v1005_v35 = vor.u32 %v1162_v33, %v1004_v32  ;;  %v1009_v37 = vor.u32 %v1161_v34, %v1006_v36  ;;  %v924_v38 = vld [vmem:[#allocation5 + $0x10] sm:$0xf]  ;;  %v1142_v39 = vld [vmem:[#allocation5 + $0x14] sm:$0xf0]  ;;  %v1141_v40 = vld [vmem:[#allocation5 + $0x14] sm:$0xf] }
  0x35   :  { %574 = vmatpush.bf16.msrb.mxu3 %v1041_v53  ;;  %v925_v41 = vor.u32 %v1142_v39, %v924_v38  ;;  %v926_v42 = vld [vmem:[#allocation5 + $0x18] sm:$0xf0]  ;;  %v996_v44 = vld [vmem:[#allocation5 + $0xa0] sm:$0xf]  ;;  %v1160_v45 = vld [vmem:[#allocation5 + $0xa4] sm:$0xf0] }
  0x36   :  { %536 = vmatpush.bf16.msrb.mxu0 %v965_v52  ;;  %v929_v43 = vor.u32 %v1141_v40, %v926_v42  ;;  %v1159_v46 = vld [vmem:[#allocation5 + $0xa4] sm:$0xf]  ;;  %v997_v47 = vor.u32 %v1160_v45, %v996_v44  ;;  %v998_v48 = vld [vmem:[#allocation5 + $0xa8] sm:$0xf0]  ;;  %v916_v50 = vld [vmem:[#allocation5] sm:$0xf] }
  0x37   :  { %549 = vmatpush.bf16.msrb.mxu1 %v1029_v62  ;;  %v1001_v49 = vor.u32 %v1159_v46, %v998_v48  ;;  %v1140_v51 = vld [vmem:[#allocation5 + $0x4] sm:$0xf0]  ;;  %v1139_v53 = vld [vmem:[#allocation5 + $0x4] sm:$0xf]  ;;  %v918_v54 = vld [vmem:[#allocation5 + $0x8] sm:$0xf0] }
  0x38   :  { %562 = vmatpush.bf16.msrb.mxu2 %v969_v57  ;;  %v917_v52 = vor.u32 %v1140_v51, %v916_v50  ;;  %v921_v55 = vor.u32 %v1139_v53, %v918_v54  ;;  %v988_v56 = vld [vmem:[#allocation5 + $0x90] sm:$0xf]  ;;  %v1158_v57 = vld [vmem:[#allocation5 + $0x94] sm:$0xf0]  ;;  %v1157_v58 = vld [vmem:[#allocation5 + $0x94] sm:$0xf] }
  0x39   :  { %575 = vmatpush.bf16.msrb.mxu3 %v1033_v0  ;;  %v989_v59 = vor.u32 %v1158_v57, %v988_v56  ;;  %v990_v60 = vld [vmem:[#allocation5 + $0x98] sm:$0xf0]  ;;  %v980_v62 = vld [vmem:[#allocation5 + $0x80] sm:$0xf]  ;;  %v1155_v0 = vld [vmem:[#allocation5 + $0x84] sm:$0xf] }
  0x3a   :  { %537 = vmatpush.bf16.msrb.mxu0 %v957_v63  ;;  %v993_v61 = vor.u32 %v1157_v58, %v990_v60  ;;  %v1156_v63 = vld [vmem:[#allocation5 + $0x84] sm:$0xf0]  ;;  %v982_v2 = vld [vmem:[#allocation5 + $0x88] sm:$0xf0]  ;;  %v1177_v5 = vld [vmem:[#allocation7 + $0x30] sm:$0xff]  ;;  %s1309_s27 = smov [#allocation8]  }
  0x3b   :  { %550 = vmatpush.bf16.msrb.mxu1 %v1021_v10  ;;  %v981_v1 = vor.u32 %v1156_v63, %v980_v62  ;;  %v985_v3 = vor.u32 %v1155_v0, %v982_v2  ;;  %v1176_v6 = vld [vmem:[#allocation7 + $0x28] sm:$0xff]  ;;  %v113_v7 = vld [vmem:[%s1385_s3] sm:$0x3]  ;;  %v1173_v30 = vld [vmem:[#allocation7 + $0x10] sm:$0xff]  ;;  %s773_s28 = sshll.u32 %s1309_s27, 4  ;;  %s775_s9 = sshll.u32 %s1390_s8, 4  ;;  %s774_s28 = int_to_ptr.vmem [resolvable:$true] %s773_s28  ;;  %s776_s9 = int_to_ptr.hbm [resolvable:$true] %s775_s9 }
  0x3c   :  { %563 = vmatpush.bf16.msrb.mxu2 %v961_v4  ;;  %v1178_v4 = vld [vmem:[#allocation7 + $0x38] sm:$0xff]  ;;  %v1175_v8 = vld [vmem:[#allocation7 + $0x20] sm:$0xff]  ;;  %v115_v9 = vperm.slane %v113_v7, 0  ;;  %v116_v15 = vperm.slane %v113_v7, 1  ;;  %v1185_v34 = vld [vmem:[#allocation7 + $0x70] sm:$0xff] }
  0x3d   :  { %576 = vmatpush.bf16.msrb.mxu3 %v1025_v12  ;;  %v1171_v32 = vld [vmem:[#allocation7] sm:$0xff]  ;;  %v1186_v33 = vld [vmem:[#allocation7 + $0x78] sm:$0xff]  ;;  %v1180_v44 = vld [vmem:[#allocation7 + $0x48] sm:$0xff] }
  0x3e   :  { %538 = vmatpush.bf16.msrb.mxu0 %v949_v11  ;;  %v1174_v11 = vld [vmem:[#allocation7 + $0x18] sm:$0xff]  ;;  %v1183_v36 = vld [vmem:[#allocation7 + $0x60] sm:$0xff] }
  0x3f   :  { %551 = vmatpush.bf16.msrb.mxu1 %v1013_v22  ;;  %v1182_v39 = vld [vmem:[#allocation7 + $0x58] sm:$0xff]  ;;  %v1179_v50 = vld [vmem:[#allocation7 + $0x40] sm:$0xff] }
  0x40   :  { %564 = vmatpush.bf16.msrb.mxu2 %v953_v16 }
  0x41   :  { %577 = vmatpush.bf16.msrb.mxu3 %v1017_v24 }
  0x42   :  { %539 = vmatpush.bf16.msrb.mxu0 %v941_v23 }
  0x43   :  { %552 = vmatpush.bf16.msrb.mxu1 %v1005_v35  ;;  %v1184_v35 = vld [vmem:[#allocation7 + $0x68] sm:$0xff] }
  0x44   :  { %565 = vmatpush.bf16.msrb.mxu2 %v945_v25 }
  0x45   :  { %578 = vmatpush.bf16.msrb.mxu3 %v1009_v37  ;;  %v369_v37 = vld [vmem:[%s1387_s5] sm:$0x3] }
  0x46   :  { %540 = vmatpush.bf16.msrb.mxu0 %v933_v29  ;;  %v371_v40 = vperm.slane %v369_v37, 0 }
  0x47   :  { %553 = vmatpush.bf16.msrb.mxu1 %v997_v47  ;;  %v372_v47 = vperm.slane %v369_v37, 1 }
  0x48   :  { %566 = vmatpush.bf16.msrb.mxu2 %v937_v31  ;;  %v1172_v31 = vld [vmem:[#allocation7 + $0x8] sm:$0xff] }
  0x49   :  { %579 = vmatpush.bf16.msrb.mxu3 %v1001_v49 }
  0x4a   :  { %541 = vmatpush.bf16.msrb.mxu0 %v925_v41  ;;  %v1181_v41 = vld [vmem:[#allocation7 + $0x50] sm:$0xff] }
  0x4b   :  { %554 = vmatpush.bf16.msrb.mxu1 %v989_v59 }
  0x4c   :  { %567 = vmatpush.bf16.msrb.mxu2 %v929_v43 }
  0x4d   :  { %580 = vmatpush.bf16.msrb.mxu3 %v993_v61 }
  0x4e   :  { %542 = vmatpush.bf16.msrb.mxu0 %v917_v52 }
  0x4f   :  { %555 = vmatpush.bf16.msrb.mxu1 %v981_v1 }
  0x50   :  { %568 = vmatpush.bf16.msrb.mxu2 %v921_v55 }
  0x51   :  { %581 = vmatpush.bf16.msrb.mxu3 %v985_v3 }
  0x52   :  { %741 = vmatpush.bf16.msra.mxu0 %v1178_v4 }
  0x53   :  { %754 = vmatpush.bf16.msra.mxu1 %v1186_v33 }
  0x56   :  { %742 = vmatpush.bf16.msra.mxu0 %v1177_v5 }
  0x57   :  { %755 = vmatpush.bf16.msra.mxu1 %v1185_v34 }
  0x5a   :  { %743 = vmatpush.bf16.msra.mxu0 %v1176_v6 }
  0x5b   :  { %756 = vmatpush.bf16.msra.mxu1 %v1184_v35 }
  0x5e   :  { %744 = vmatpush.bf16.msra.mxu0 %v1175_v8 }
  0x5f   :  { %757 = vmatpush.bf16.msra.mxu1 %v1183_v36 }
  0x62   :  { %745 = vmatpush.bf16.msra.mxu0 %v1174_v11 }
  0x63   :  { %758 = vmatpush.bf16.msra.mxu1 %v1182_v39 }
  0x66   :  { %746 = vmatpush.bf16.msra.mxu0 %v1173_v30 }
  0x67   :  { %759 = vmatpush.bf16.msra.mxu1 %v1181_v41 }
  0x6a   :  { %747 = vmatpush.bf16.msra.mxu0 %v1172_v31 }
  0x6b   :  { %760 = vmatpush.bf16.msra.mxu1 %v1180_v44 }
  0x6e   :  { %748 = vmatpush.bf16.msra.mxu0 %v1171_v32 }
  0x6f   :  { %761 = vmatpush.bf16.msra.mxu1 %v1179_v50 }
  0xae   :  { %v288_v10 = vpop.f32.mrf.mxu0 }
  0xaf   :  { %v289_v12 = vadd.f32 %v288_v10, %v115_v9  ;;  %v301_v13 = vpop.f32.mrf.mxu1  ;;  %v1195_v10 = vld [vmem:[%s1389_s7] ss:$0 sm:$0xff] }
  0xb1   :  { %v302_v14 = vadd.f32 %v301_v13, %v289_v12 }
  0xb3   :  { %v331_v16 = vmul.f32 0.2, %v302_v14 }
  0xb5   :  { %v333_v17 = vmax.f32 %v302_v14, %v331_v16 }
  0xb6   :  { %v314_v18 = vpop.f32.mrf.mxu2  ;;  %v290_v21 = vpop.f32.mrf.mxu0 }
  0xb7   :  { %v315_v19 = vadd.f32 %v314_v18, %v116_v15  ;;  %v327_v20 = vpop.f32.mrf.mxu3  ;;  %v335_v22 = vpack.c.bf16 %v333_v17, %v333_v17  ;;  %v303_v23 = vpop.f32.mrf.mxu1 }
  0xb9   :  { %v328_v24 = vadd.f32 %v327_v20, %v315_v19  ;;  %543 = vmatmul.bf16.vlgmr.msrb.gmra.mxu0 %v335_v22  ;;  %569 = vmatmul.bf16.vlgmr.msrb.gmra.mxu2 %v335_v22 }
  0xbb   :  { %v332_v25 = vmul.f32 0.2, %v328_v24 }
  0xbd   :  { %v334_v26 = vmax.f32 %v328_v24, %v332_v25 }
  0xbe   :  { %v316_v27 = vpop.f32.mrf.mxu2 }
  0xbf   :  { %v336_v28 = vpack.c.bf16 %v334_v26, %v334_v26  ;;  %v329_v29 = vpop.f32.mrf.mxu3 }
  0xc1   :  { %556 = vmatmul.bf16.vlgmr.msrb.gmra.mxu1 %v336_v28  ;;  %582 = vmatmul.bf16.vlgmr.msrb.gmra.mxu3 %v336_v28 }
 0x136   :  { %v544_v38 = vpop.f32.mrf.mxu0 }
 0x137   :  { %v545_v42 = vadd.f32 %v544_v38, %v371_v40 }
 0x13c   :  { %v570_v43 = vpop.f32.mrf.mxu2 }
 0x13d   :  { %v571_v51 = vadd.f32 %v570_v43, %v372_v47 }
 0x13e   :  { %v557_v45 = vpop.f32.mrf.mxu1  ;;  %v546_v48 = vpop.f32.mrf.mxu0 }
 0x13f   :  { %v558_v46 = vadd.f32 %v557_v45, %v545_v42 }
 0x141   :  { %v607_v49 = vpack.c.bf16 %v558_v46, %v558_v46 }
 0x143   :  { %749 = vmatmul.bf16.vlgmr.msra.gmra.mxu0 %v607_v49 }
 0x144   :  { %v583_v52 = vpop.f32.mrf.mxu3  ;;  %v572_v54 = vpop.f32.mrf.mxu2 }
 0x145   :  { %v584_v53 = vadd.f32 %v583_v52, %v571_v51 }
 0x146   :  { %v559_v55 = vpop.f32.mrf.mxu1 }
 0x147   :  { %v587_v56 = vmul.f32 %v584_v53, %v558_v46 }
 0x149   :  { %v1042_v57 = vmul.f32 -1.442695, %v587_v56 }
 0x14b   :  { %1196 = vpow2.f32 %v1042_v57 }
 0x14c   :  { %v585_v58 = vpop.f32.mrf.mxu3 }
 0x151   :  { %v1197_v59 = vpop.eup %1196 }
 0x152   :  { %v591_v60 = vadd.f32 1.0, %v1197_v59 }
 0x154   :  { %1198 = vrcp.f32 %v591_v60  ;;  %v603_v0 = vand.u32 2147483648, %v591_v60  ;;  %v601_v2 = vand.u32 2147483647, %v591_v60  ;;  %vm597_vm1 = vweird.f32 %v591_v60 }
 0x156   :  { %v604_v4 = vor.u32 1.1754944e-38, %v603_v0  ;;  %vm602_vm3 = vcmp.eq.f32.partialorder %v601_v2, 8.507059e+37 }
 0x15a   :  { %v1199_v61 = vpop.eup %1198 }
 0x15b   :  { %v593_v62 = vmul.f32 %v1199_v61, %v591_v60  ;;  %vm598_vm0 = vweird.f32 %v1199_v61 }
 0x15c   :  { %vm599_vm2 = vmor %vm597_vm1, %vm598_vm0 }
 0x15d   :  { %v594_v63 = vsub.f32 1.0, %v593_v62 }
 0x15f   :  { %v595_v1 = vmul.f32 %v1199_v61, %v594_v63 }
 0x161   :  { %v596_v3 = vadd.f32 %v1199_v61, %v595_v1 }
 0x163   :  { %v600_v5 = vsel %vm599_vm2, %v1199_v61, %v596_v3 }
 0x164   :  { %v605_v6 = vsel %vm602_vm3, %v604_v4, %v600_v5 }
 0x165   :  { %v608_v7 = vpack.c.bf16 %v605_v6, %v605_v6 }
 0x167   :  { %762 = vmatmul.bf16.vlgmr.msra.gmra.mxu1 %v608_v7 }
 0x1c0   :  { %v750_v8 = vpop.f32.mrf.mxu0 }
 0x1c1   :  { %v751_v11 = vadd.f32 %v1195_v10, %v750_v8 }
 0x1c8   :  { %v752_v9 = vpop.f32.mrf.mxu0 }
 0x1e4   :  { %v763_v12 = vpop.f32.mrf.mxu1 }
 0x1e5   :  { %v764_v13 = vadd.f32 %v763_v12, %v751_v11 }
 0x1e7   :  { %767 = vst [vmem:[#allocation8] sm:$0x3] %v764_v13 }
 0x1e8   :  { %778 = dma.vmem_to_hbm [thread:$0]  %s774_s28, 32, %s776_s9, [#allocation4]  }
 0x1ec   :  { %v765_v14 = vpop.f32.mrf.mxu1 }
 0x1ed   :  { %1300 = dma.done.wait [#allocation4], 32  }
 0x1ee   :  { %1301 = vsyncadd [#allocation4], 4294967264 }
 0x1ef   :  { %783 = vsyncpa [#allocation3], 1 }
 0x1f0   :  { %784 = vsyncpa [#allocation6], 1 }
 0x1f1   :  { %785 = vsyncpa [#allocation4], 1 }

</bundles_post_ra>
